<compile_context>
chip_gen: v6e
topology: v6e:2x2x1
jax: 0.10.0
libtpu: 0.0.40
codegen_flags: <defaults>
</compile_context>

<pallas_src>
import math
import functools

import jax
import jax.numpy as jnp
from jax import lax
from jax.experimental import pallas as pl
from jax.experimental.pallas import tpu as pltpu


# ------------------- kernel 1: per-channel sums for GroupNorm statistics -------------------
def gn_sums_kernel(x_ref, sum_ref, sq_ref):
    s_idx = pl.program_id(2)

    @pl.when(s_idx == 0)
    def _():
        sum_ref[...] = jnp.zeros(sum_ref.shape, sum_ref.dtype)
        sq_ref[...] = jnp.zeros(sq_ref.shape, sq_ref.dtype)

    x = x_ref[0].astype(jnp.float32)                          # (Cblk, tS)
    sum_ref[0] += jnp.sum(x, axis=-1, keepdims=True)          # (Cblk, 1)
    sq_ref[0] += jnp.sum(x * x, axis=-1, keepdims=True)       # (Cblk, 1)


# ------------------------ kernel 2: GroupNorm + K / V projections --------------------------
def norm_kv_kernel(x_ref, scale_ref, shift_ref, wkT_ref, bk_ref, wv_ref, bv_ref,
                   kt_ref, v_ref):
    x = x_ref[0].astype(jnp.float32)                          # (C, tS)
    # GroupNorm folded into per-(batch, channel) scale / shift
    xn = x * scale_ref[0] + shift_ref[0]                      # (C, tS) f32
    xn_bf = xn.astype(jnp.bfloat16)

    # V in (C, S) layout: (C, C) @ (C, tS) — native MXU orientation
    v = jnp.dot(wv_ref[...], xn_bf,
                preferred_element_type=jnp.float32) + bv_ref[...]
    v_ref[0] = v.astype(jnp.bfloat16)

    # K stored transposed, (S, C) layout, so kernel 3 never transposes:
    # one in-VMEM transpose per tile (amortized over all KV reuse downstream).
    xn_t = jnp.transpose(xn).astype(jnp.bfloat16)             # (tS, C)
    kt = jnp.dot(xn_t, wkT_ref[...],
                 preferred_element_type=jnp.float32) + bk_ref[...]
    kt_ref[0] = kt.astype(jnp.bfloat16)


# ------- kernel 3: fused Q proj + flash attention + output proj + residual + rescale -------
def flash_attn_proj_kernel(x_ref, scale_ref, shift_ref, wq_ref, bq_ref,
                           kt_ref, v_ref, wp_ref, bp_ref, o_ref,
                           q_sc, m_sc, l_sc, acc_sc, *, inv_rescale):
    j = pl.program_id(2)

    @pl.when(j == 0)
    def _():
        # Q projection on the fly from the residual tile (attention scale folded in Wq/bq).
        xn = x_ref[0].astype(jnp.float32) * scale_ref[0] + shift_ref[0]   # (C, tq)
        q = jnp.dot(wq_ref[...], xn.astype(jnp.bfloat16),
                    preferred_element_type=jnp.float32) + bq_ref[...]
        q_sc[...] = q.astype(jnp.bfloat16)                                # (C, tq)
        m_sc[...] = jnp.full(m_sc.shape, -jnp.inf, dtype=m_sc.dtype)      # (1, tq)
        l_sc[...] = jnp.zeros(l_sc.shape, l_sc.dtype)
        acc_sc[...] = jnp.zeros(acc_sc.shape, acc_sc.dtype)

    # scores tile only, (tkv, tq): (tkv, C) @ (C, tq) — native; softmax axis is sublanes
    s = jnp.dot(kt_ref[0], q_sc[...], preferred_element_type=jnp.float32)
    m_prev = m_sc[...]
    m_new = jnp.maximum(m_prev, jnp.max(s, axis=0, keepdims=True))        # (1, tq)
    alpha = jnp.exp(m_prev - m_new)
    p = jnp.exp(s - m_new)                                                # (tkv, tq) f32
    l_sc[...] = alpha * l_sc[...] + jnp.sum(p, axis=0, keepdims=True)
    acc_sc[...] = alpha * acc_sc[...] + jnp.dot(
        v_ref[0], p.astype(jnp.bfloat16), preferred_element_type=jnp.float32)  # (C, tq)
    m_sc[...] = m_new

    @pl.when(j == pl.num_programs(2) - 1)
    def _():
        # deferred softmax normalization on the (C, tq) accumulator
        attn = acc_sc[...] * pl.reciprocal(l_sc[...], approx=True)
        out = jnp.dot(wp_ref[...], attn.astype(jnp.bfloat16),
                      preferred_element_type=jnp.float32) + bp_ref[...]
        o_ref[0] = ((out + x_ref[0].astype(jnp.float32)) * inv_rescale).astype(o_ref.dtype)


# ----------------------------------------- wrapper -----------------------------------------
def _pick_tile(S, target):
    """Largest multiple of 128 that divides S and is <= target (lane-dim tiling); else S."""
    if S <= target or S % 128 != 0:
        return S
    t = (min(target, S) // 128) * 128
    while t >= 128 and S % t != 0:
        t -= 128
    return t if t >= 128 else S


def _cparams(dim_sem, est_bytes):
    # vmem_limit derived from buffer sizes (double-buffer worst case + headroom);
    # v5e's scoped default is only 16 MiB, so make it explicit.
    limit = int(min(max(2 * est_bytes + (4 << 20), 32 << 20), 48 << 20))
    return pltpu.CompilerParams(dimension_semantics=dim_sem, vmem_limit_bytes=limit)


def attention_block(x_nchw, params, *, num_groups, eps=1e-5,
                    rescale_output_factor=1.0,
                    tile_s=None, tile_q=None, tile_kv=None):
    """Pallas implementation of diffusers AttentionBlock.forward (num_head_channels=None)."""
    B, C, H, W = x_nchw.shape
    S = H * W
    G = num_groups
    assert C % G == 0 and C % 8 == 0
    gs = C // G
    scale_attn = 1.0 / math.sqrt(math.sqrt(C / 1.0))          # 1 head
    xbytes = jnp.dtype(x_nchw.dtype).itemsize

    tile_s = _pick_tile(S, 512) if tile_s is None else tile_s
    tile_q = _pick_tile(S, 512) if tile_q is None else tile_q
    tile_kv = _pick_tile(S, 1024) if tile_kv is None else tile_kv
    for t in (tile_s, tile_q, tile_kv):
        # spatial is the lane dim in this layout: tiles must be 128-aligned or full
        assert S % t == 0 and (t == S or t % 128 == 0), (t, S)
    n_s, n_q, n_kv = S // tile_s, S // tile_q, S // tile_kv

    # channel-block split for the stats pass (feeds both TensorCores on v7x at small B)
    n_cb = 2 if (C % (2 * gs) == 0 and (C // 2) % 8 == 0 and C >= 16) else 1
    c_blk = C // n_cb

    # native (B, C, S) layout: reshape only, no HBM transpose
    x_cs = x_nchw.reshape(B, C, S)

    # ---------------- kernel 1: per-channel sums ----------------
    est1 = c_blk * tile_s * xbytes + 4 * c_blk * 8
    chan_sum, chan_sq = pl.pallas_call(
        gn_sums_kernel,
        out_shape=(jax.ShapeDtypeStruct((B, C, 1), jnp.float32),
                   jax.ShapeDtypeStruct((B, C, 1), jnp.float32)),
        grid_spec=pltpu.PrefetchScalarGridSpec(
            num_scalar_prefetch=0,
            grid=(B, n_cb, n_s),
            in_specs=[pl.BlockSpec((1, c_blk, tile_s), lambda b, cb, s: (b, cb, s))],
            out_specs=(pl.BlockSpec((1, c_blk, 1), lambda b, cb, s: (b, cb, 0)),
                       pl.BlockSpec((1, c_blk, 1), lambda b, cb, s: (b, cb, 0)))),
        compiler_params=_cparams(("parallel", "parallel", "arbitrary"), est1),
    )(x_cs)

    # O(B*C) group combine + affine fold — tiny, done in plain jnp.
    inv_n = 1.0 / float(S * gs)
    g_sum = chan_sum[:, :, 0].reshape(B, G, gs).sum(-1)
    g_sq = chan_sq[:, :, 0].reshape(B, G, gs).sum(-1)
    g_mean = g_sum * inv_n
    g_var = jnp.maximum(g_sq * inv_n - g_mean * g_mean, 0.0)
    g_invstd = lax.rsqrt(g_var + float(eps))
    mean_c = jnp.repeat(g_mean, gs, axis=1)                   # (B, C)
    invstd_c = jnp.repeat(g_invstd, gs, axis=1)
    gamma = params["gamma"].astype(jnp.float32)[None, :]
    beta = params["beta"].astype(jnp.float32)[None, :]
    gn_scale = (gamma * invstd_c)[:, :, None].astype(jnp.float32)              # (B, C, 1)
    gn_shift = (beta - mean_c * gamma * invstd_c)[:, :, None].astype(jnp.float32)

    # weight prep: attention scale folded into Wq/bq and Wk/bk; weights used in (out,in)
    # orientation for the (C,S) layout, K weights pre-transposed for the (S,C) K output.
    wq_s = (params["wq"].astype(jnp.float32) * scale_attn).astype(jnp.bfloat16)   # (C, C)
    bq_col = (params["bq"].astype(jnp.float32) * scale_attn).reshape(C, 1)
    wkT_s = (params["wk"].astype(jnp.float32) * scale_attn).T.astype(jnp.bfloat16)
    bk_row = (params["bk"].astype(jnp.float32) * scale_attn).reshape(1, C)
    wv = params["wv"].astype(jnp.bfloat16)
    bv_col = params["bv"].astype(jnp.float32).reshape(C, 1)
    wp = params["wp"].astype(jnp.bfloat16)
    bp_col = params["bp"].astype(jnp.float32).reshape(C, 1)

    # ---------------- kernel 2: GroupNorm + K / V projections ----------------
    est2 = (C * tile_s * xbytes + 2 * C * 4 + 2 * C * C * 2 + 2 * C * 4
            + 2 * C * tile_s * 2)
    kt, v = pl.pallas_call(
        norm_kv_kernel,
        out_shape=(jax.ShapeDtypeStruct((B, S, C), jnp.bfloat16),     # K^T
                   jax.ShapeDtypeStruct((B, C, S), jnp.bfloat16)),    # V
        grid_spec=pltpu.PrefetchScalarGridSpec(
            num_scalar_prefetch=0,
            grid=(B, n_s),
            in_specs=[
                pl.BlockSpec((1, C, tile_s), lambda b, s: (b, 0, s)),   # x
                pl.BlockSpec((1, C, 1), lambda b, s: (b, 0, 0)),        # gn scale
                pl.BlockSpec((1, C, 1), lambda b, s: (b, 0, 0)),        # gn shift
                pl.BlockSpec((C, C), lambda b, s: (0, 0)),              # Wk^T (scaled, bf16)
                pl.BlockSpec((1, C), lambda b, s: (0, 0)),              # bk (scaled)
                pl.BlockSpec((C, C), lambda b, s: (0, 0)),              # Wv (bf16)
                pl.BlockSpec((C, 1), lambda b, s: (0, 0)),              # bv
            ],
            out_specs=(pl.BlockSpec((1, tile_s, C), lambda b, s: (b, s, 0)),
                       pl.BlockSpec((1, C, tile_s), lambda b, s: (b, 0, s)))),
        compiler_params=_cparams(("parallel", "parallel"), est2),
    )(x_cs, gn_scale, gn_shift, wkT_s, bk_row, wv, bv_col)

    # ----- kernel 3: fused Q proj + flash attention + out proj + residual + rescale -----
    flash = functools.partial(flash_attn_proj_kernel,
                              inv_rescale=1.0 / float(rescale_output_factor))
    est3 = (C * tile_q * xbytes + 2 * C * 4 + 2 * C * C * 2 + 2 * C * 4
            + 2 * C * tile_kv * 2 + C * tile_q * xbytes
            + C * tile_q * 2 + C * tile_q * 4 + 2 * tile_q * 4 * 8)
    out_cs = pl.pallas_call(
        flash,
        out_shape=jax.ShapeDtypeStruct((B, C, S), x_nchw.dtype),
        grid_spec=pltpu.PrefetchScalarGridSpec(
            num_scalar_prefetch=0,
            grid=(B, n_q, n_kv),
            in_specs=[
                pl.BlockSpec((1, C, tile_q), lambda b, i, j: (b, 0, i)),   # x (Q src + residual)
                pl.BlockSpec((1, C, 1), lambda b, i, j: (b, 0, 0)),        # gn scale
                pl.BlockSpec((1, C, 1), lambda b, i, j: (b, 0, 0)),        # gn shift
                pl.BlockSpec((C, C), lambda b, i, j: (0, 0)),              # Wq (scaled, bf16)
                pl.BlockSpec((C, 1), lambda b, i, j: (0, 0)),              # bq (scaled)
                pl.BlockSpec((1, tile_kv, C), lambda b, i, j: (b, j, 0)),  # K^T
                pl.BlockSpec((1, C, tile_kv), lambda b, i, j: (b, 0, j)),  # V
                pl.BlockSpec((C, C), lambda b, i, j: (0, 0)),              # Wp (bf16)
                pl.BlockSpec((C, 1), lambda b, i, j: (0, 0)),              # bp
            ],
            out_specs=pl.BlockSpec((1, C, tile_q), lambda b, i, j: (b, 0, i)),
            scratch_shapes=[pltpu.VMEM((C, tile_q), jnp.bfloat16),   # Q (computed once/tile)
                            pltpu.VMEM((1, tile_q), jnp.float32),    # running max (lane-dense)
                            pltpu.VMEM((1, tile_q), jnp.float32),    # running sum (lane-dense)
                            pltpu.VMEM((C, tile_q), jnp.float32)]),  # accumulator
        compiler_params=_cparams(("parallel", "parallel", "arbitrary"), est3),
    )(x_cs, gn_scale, gn_shift, wq_s, bq_col, kt, v, wp, bp_col)

    # free reshape back to NCHW (already in the input dtype)
    return out_cs.reshape(B, C, H, W)


# ----------------------------------- pure-JAX reference -----------------------------------
def reference_attention_block(x, params, *, num_groups, eps=1e-5,
                              rescale_output_factor=1.0):
    B, C, H, W = x.shape
    G = num_groups
    xg = x.reshape(B, G, C // G, H, W)
    mean = xg.mean(axis=(2, 3, 4), keepdims=True)
    var = xg.var(axis=(2, 3, 4), keepdims=True)
    xn = (xg - mean) / jnp.sqrt(var + eps)
    xn = xn.reshape(B, C, H, W)
    xn = xn * params["gamma"][None, :, None, None] + params["beta"][None, :, None, None]

    h = jnp.transpose(xn.reshape(B, C, H * W), (0, 2, 1))        # (B, S, C)
    q = h @ params["wq"].T + params["bq"]
    k = h @ params["wk"].T + params["bk"]
    v = h @ params["wv"].T + params["bv"]
    scale = 1.0 / math.sqrt(math.sqrt(C / 1.0))
    scores = jnp.einsum("bqc,bkc->bqk", q * scale, k * scale)
    probs = jax.nn.softmax(scores.astype(jnp.float32), axis=-1).astype(scores.dtype)
    attn = jnp.einsum("bqk,bkc->bqc", probs, v)
    out = attn @ params["wp"].T + params["bp"]
    out = jnp.transpose(out, (0, 2, 1)).reshape(B, C, H, W)
    return (out + x) / rescale_output_factor


def make_params(key, channels):
    ks = jax.random.split(key, 8)
    C = channels
    lim = 1.0 / math.sqrt(C)
    u = lambda k, shape: jax.random.uniform(k, shape, jnp.float32, -lim, lim)
    return {
        "gamma": jnp.ones((C,), jnp.float32),
        "beta": jnp.zeros((C,), jnp.float32),
        "wq": u(ks[0], (C, C)), "bq": u(ks[1], (C,)),
        "wk": u(ks[2], (C, C)), "bk": u(ks[3], (C,)),
        "wv": u(ks[4], (C, C)), "bv": u(ks[5], (C,)),
        "wp": u(ks[6], (C, C)), "bp": u(ks[7], (C,)),
    }


if __name__ == "__main__":
    # Small lane-dense demo: C multiple of 128, S = 256 so 128-wide tiles exercise the
    # multi-step stats accumulation, the Q/KV tiling and the online-softmax path.
    B, C, H, W = 2, 128, 16, 16        # S = 256
    num_groups = 32                    # module default
    eps = 1e-5
    rescale = 1.0

    key = jax.random.PRNGKey(0)
    kx, kp = jax.random.split(key)
    x = jax.random.normal(kx, (B, C, H, W), jnp.float32)
    params = make_params(kp, C)

    out = attention_block(x, params, num_groups=num_groups, eps=eps,
                          rescale_output_factor=rescale,
                          tile_s=128, tile_q=128, tile_kv=128)
    out = jax.block_until_ready(out)

    ref = reference_attention_block(x, params, num_groups=num_groups, eps=eps,
                                    rescale_output_factor=rescale)
    ref = jax.block_until_ready(ref)

    assert out.shape == (B, C, H, W)
    max_err = float(jnp.max(jnp.abs(out - ref)))
    # bf16 MXU operands (f32 accumulation) -> tolerance looser than a pure-f32 kernel
    assert jnp.allclose(out, ref, rtol=3e-2, atol=3e-2), max_err
    print("KERNEL_OK")
</pallas_src>

<mosaic_0001>
module attributes {stable_mosaic.version = 11 : i64} {
  func.func @gn_sums_kernel(%arg0: i32, %arg1: i32, %arg2: i32, %arg3: memref<1x64x128xf32, #tpu.memory_space<vmem>>, %arg4: memref<1x64x1xf32, #tpu.memory_space<vmem>>, %arg5: memref<1x64x1xf32, #tpu.memory_space<vmem>>) attributes {dimension_semantics = [#tpu.dimension_semantics<parallel>, #tpu.dimension_semantics<parallel>, #tpu.dimension_semantics<arbitrary>], iteration_bounds = array<i64: 2, 2, 2>, scalar_prefetch = 0 : i64, scratch_operands = 0 : i64, tpu.core_type = #tpu.core_type<tc>, window_params = [{transform_indices = @transform_0, window_bounds = array<i64: 1, 64, 128>}, {transform_indices = @transform_1, window_bounds = array<i64: 1, 64, 1>}, {transform_indices = @transform_2, window_bounds = array<i64: 1, 64, 1>}]} {
    %c0_i32 = arith.constant 0 : i32
    %0 = arith.cmpi eq, %arg2, %c0_i32 : i32
    %1 = arith.extui %0 : i1 to i32
    %c0_i32_0 = arith.constant 0 : i32
    %2 = arith.cmpi ne, %1, %c0_i32_0 : i32
    scf.if %2 {
      %cst_16 = arith.constant 0.000000e+00 : f32
      %22 = vector.broadcast %cst_16 : f32 to vector<1x64x1xf32>
      %c0_17 = arith.constant 0 : index
      %c0_18 = arith.constant 0 : index
      %c0_19 = arith.constant 0 : index
      %23 = vector.load %arg4[%c0_17, %c0_18, %c0_19] : memref<1x64x1xf32, #tpu.memory_space<vmem>>, vector<1x64x1xf32>
      tpu.vector_store %arg4[%c0_17, %c0_18, %c0_19], %22 {strides = array<i32>} : memref<1x64x1xf32, #tpu.memory_space<vmem>>, vector<1x64x1xf32>,
      %cst_20 = arith.constant 0.000000e+00 : f32
      %24 = vector.broadcast %cst_20 : f32 to vector<1x64x1xf32>
      %c0_21 = arith.constant 0 : index
      %c0_22 = arith.constant 0 : index
      %c0_23 = arith.constant 0 : index
      %25 = vector.load %arg5[%c0_21, %c0_22, %c0_23] : memref<1x64x1xf32, #tpu.memory_space<vmem>>, vector<1x64x1xf32>
      tpu.vector_store %arg5[%c0_21, %c0_22, %c0_23], %24 {strides = array<i32>} : memref<1x64x1xf32, #tpu.memory_space<vmem>>, vector<1x64x1xf32>,
    } else {
    }
    %c0 = arith.constant 0 : index
    %c0_1 = arith.constant 0 : index
    %c0_2 = arith.constant 0 : index
    %3 = vector.load %arg3[%c0, %c0_1, %c0_2] : memref<1x64x128xf32, #tpu.memory_space<vmem>>, vector<1x64x128xf32>
    %4 = vector.shape_cast %3 : vector<1x64x128xf32> to vector<64x128xf32>
    %c0_3 = arith.constant 0 : index
    %c0_4 = arith.constant 0 : index
    %c0_5 = arith.constant 0 : index
    %5 = vector.load %arg4[%c0_3, %c0_4, %c0_5] : memref<1x64x1xf32, #tpu.memory_space<vmem>>, vector<1x64x1xf32>
    %6 = vector.shape_cast %5 : vector<1x64x1xf32> to vector<64x1xf32>
    %cst = arith.constant dense<0.000000e+00> : vector<64xf32>
    %7 = vector.multi_reduction <add>, %4, %cst [1] : vector<64x128xf32> to vector<64xf32>
    %8 = vector.shape_cast %7 : vector<64xf32> to vector<64x1xf32>
    %9 = arith.addf %6, %8 : vector<64x1xf32>
    %c0_6 = arith.constant 0 : index
    %c0_7 = arith.constant 0 : index
    %c0_8 = arith.constant 0 : index
    %10 = vector.load %arg4[%c0_6, %c0_7, %c0_8] : memref<1x64x1xf32, #tpu.memory_space<vmem>>, vector<1x64x1xf32>
    %11 = vector.shape_cast %10 : vector<1x64x1xf32> to vector<64x1xf32>
    %12 = vector.shape_cast %9 : vector<64x1xf32> to vector<1x64x1xf32>
    tpu.vector_store %arg4[%c0_6, %c0_7, %c0_8], %12 {strides = array<i32>} : memref<1x64x1xf32, #tpu.memory_space<vmem>>, vector<1x64x1xf32>,
    %c0_9 = arith.constant 0 : index
    %c0_10 = arith.constant 0 : index
    %c0_11 = arith.constant 0 : index
    %13 = vector.load %arg5[%c0_9, %c0_10, %c0_11] : memref<1x64x1xf32, #tpu.memory_space<vmem>>, vector<1x64x1xf32>
    %14 = vector.shape_cast %13 : vector<1x64x1xf32> to vector<64x1xf32>
    %15 = arith.mulf %4, %4 : vector<64x128xf32>
    %cst_12 = arith.constant dense<0.000000e+00> : vector<64xf32>
    %16 = vector.multi_reduction <add>, %15, %cst_12 [1] : vector<64x128xf32> to vector<64xf32>
    %17 = vector.shape_cast %16 : vector<64xf32> to vector<64x1xf32>
    %18 = arith.addf %14, %17 : vector<64x1xf32>
    %c0_13 = arith.constant 0 : index
    %c0_14 = arith.constant 0 : index
    %c0_15 = arith.constant 0 : index
    %19 = vector.load %arg5[%c0_13, %c0_14, %c0_15] : memref<1x64x1xf32, #tpu.memory_space<vmem>>, vector<1x64x1xf32>
    %20 = vector.shape_cast %19 : vector<1x64x1xf32> to vector<64x1xf32>
    %21 = vector.shape_cast %18 : vector<64x1xf32> to vector<1x64x1xf32>
    tpu.vector_store %arg5[%c0_13, %c0_14, %c0_15], %21 {strides = array<i32>} : memref<1x64x1xf32, #tpu.memory_space<vmem>>, vector<1x64x1xf32>,
    return
  }
  func.func @transform_0(%arg0: i32, %arg1: i32, %arg2: i32) -> (i32, i32, i32) {
    %c0_i32 = arith.constant 0 : i32
    return %arg0, %arg1, %arg2 : i32, i32, i32
  }
  func.func @transform_1(%arg0: i32, %arg1: i32, %arg2: i32) -> (i32, i32, i32) {
    %c0_i32 = arith.constant 0 : i32
    %c0_i32_0 = arith.constant 0 : i32
    return %arg0, %arg1, %c0_i32 : i32, i32, i32
  }
  func.func @transform_2(%arg0: i32, %arg1: i32, %arg2: i32) -> (i32, i32, i32) {
    %c0_i32 = arith.constant 0 : i32
    %c0_i32_0 = arith.constant 0 : i32
    return %arg0, %arg1, %c0_i32 : i32, i32, i32
  }
}

</mosaic_0001>

<bundles_post_ra>
// kernel: tpu_custom_call.1
= control target key start
LH: loop header
LB: loop body
LE: loop exit
PB: predicated region body
PF: predicated region fallthrough
CT: control target
= control target key end

     0   :  { %8 = vsyncpa [#allocation3], 0  ;;  %s989_s0 = inlined_call_operand.hbm [shape: f32[2,128,256], index: 0, kind: input, shape index: {}]   ;;  %s990_s1 = inlined_call_operand.vmem [shape: f32[2,128,1], index: 1, kind: output, shape index: {0}]   ;;  %s991_s2 = inlined_call_operand.vmem [shape: f32[2,128,1], index: 2, kind: output, shape index: {1}]  }
   0x1   :  { %10 = vsyncpa [#allocation3 + $0x1], 0  ;;  %s744_s9 = smov 0   ;;  %s746_s10 = smov 0  }
   0x2   :  { %s748_s11 = smov 0   ;;  %s750_s12 = smov 0  }
   0x3   :  { %s752_s13 = smov 0   ;;  %s754_s14 = smov 0  }
   0x4   :  { %s756_s15 = smov 0   ;;  %s758_s16 = smov 0  }
   0x5   :  { %s760_s17 = smov 0   ;;  %s762_s18 = smov 0  }
   0x6 LB: > { %995 = sst [smem:[#allocation5_spill]] %s698_s12  ;;  %s500_s19 = sadd.s32 4294967295, %s722_s18   ;;  %s722_s18 = sphi %s762_s18, %s16_s18   ;;  %s718_s17 = sphi %s760_s17, %s1014_s17   ;;  %s714_s16 = sphi %s758_s16, %s1013_s16   ;;  %s710_s15 = sphi %s756_s15, %s1012_s15   ;;  %s706_s14 = sphi %s754_s14, %s1011_s14   ;;  %s702_s13 = sphi %s752_s13, %s1010_s13   ;;  %s698_s12 = sphi %s750_s12, %s1009_s12   ;;  %s694_s11 = sphi %s748_s11, %s1008_s11   ;;  %s690_s10 = sphi %s746_s10, %s1007_s10   ;;  %s686_s9 = sphi %s744_s9, %s1006_s9  }
   0x7   : > { %s28_s20 = sadd.s32 1, %s710_s15  ;;  %s31_s21 = sadd.s32 1, %s714_s16 }
   0x8   : > { %p29_p0 = scmp.ge.s32.totalorder %s28_s20, 2  ;;  %s35_s22 = sadd.s32 1, %s718_s17 }
   0x9   : > { %s46_s23 = sadd.s32 1, %s694_s11  ;;  %p53_p1 = scmp.ne.s32.totalorder %s694_s11, %s690_s10 }
   0xa   : > { %s1016_s20 = smov (%p29_p0, %s28_s20), 0  ;;  %s1018_s21 = smov (!%p29_p0, %s31_s21), %s714_s16 }
   0xb   : > { %996 = sst [smem:[#allocation6_spill]] %s1016_s20  ;;  %s42_s24 = ssub.s32 %s710_s15, %s1016_s20 }
   0xc   : > { %p33_p2 = scmp.ge.s32.totalorder %s1018_s21, 2  ;;  %p54_p3 = scmp.eq.s32.totalorder %s722_s18, 0 }
   0xd   : > { %p59_p4 = scmp.ne.s32.totalorder %s690_s10, %s686_s9  ;;  %p60_p5 = scmp.eq.s32.totalorder %s500_s19, 0 }
   0xe   : > { %s1020_s21 = smov (%p33_p2, %s1018_s21), 0  ;;  %s1022_s22 = smov (!%p33_p2, %s35_s22), %s718_s17 }
   0xf   : > { %997 = sst [smem:[#allocation7_spill]] %s1020_s21  ;;  %s40_s25 = ssub.s32 %s714_s16, %s1020_s21 }
  0x10   : > { %p811_p6 = por %p54_p3, %p53_p1  ;;  %p37_p7 = scmp.ge.s32.totalorder %s1022_s22, 2 }
  0x11   : > { %p815_p8 = por %p60_p5, %p59_p4  ;;  %p527_p9 = scmp.lt.s32.totalorder %s722_s18, 8 }
  0x12   : > { %s1024_s22 = smov (%p37_p7, %s1022_s22), 0  ;;  %s139_s28 = sand.u32 1, %s694_s11  }
  0x13   : > { %1000 = sst [smem:[#allocation8_spill]] %s1024_s22  ;;  %s520_s29 = sshll.u32 %s714_s16, 4 }
  0x14   : > { %s39_s30 = ssub.s32 %s718_s17, %s1024_s22  ;;  %s504_s4 = sshll.u32 %s139_s28, 6 }
  0x15   : > { %s41_s3 = sor.u32 %s40_s25, %s39_s30  ;;  %s149_s6 = sadd.s32 %s710_s15, %s520_s29 }
  0x16   : > { %s43_s5 = sor.u32 %s42_s24, %s41_s3  ;;  %s507_s7 = sshll.u32 %s718_s17, 5 }
  0x17   : > { %p44_p10 = scmp.eq.s32.totalorder %s43_s5, 0  ;;  %s143_s8 = scalar_lea.vmem [#allocation2], %s504_s4 }
  0x18   : > { %s154_s9 = sshll.u32 %s143_s8, 4  ;;  %s151_s21 = sadd.s32 %s507_s7, %s149_s6  ;;  %s155_s9 = int_to_ptr.vmem [resolvable:$true] %s154_s9 }
  0x19   : > { %s829_s19 = scalar_select %p44_p10, %s694_s11, %s46_s23  }
  0x1a   : > { %s508_s20 = sshll.u32 %s151_s21, 7  ;;  %p835_p11 = pnand %p527_p9, %p811_p6 }
  0x1b   : > { %s153_s24 = scalar_lea.hbm %s989_s0, %s508_s20  ;;  %p509_p12 = scmp.ge.s32.totalorder %s722_s18, 1 }
  0x1c   : > { %s140_s29 = scalar_lea.sflag [#allocation3], %s139_s28  ;;  %p614_p13 = pneg %p835_p11 }
  0x1d   : > { %s625_s23 = scalar_lea.vmem %s155_s9, 1024  ;;  %s724_s21 = smov [#allocation2]  }
  0x1e   : > { %p626_p0 = scmp.ne.s32.totalorder %s155_s9, %s625_s23  ;;  %s630_s26 = sshll.u32 %s724_s21, 4  ;;  %s631_s26 = int_to_ptr.vmem [resolvable:$false] %s630_s26 }
  0x1f   : > { %s632_s30 = scalar_lea.vmem %s631_s26, 2048  ;;  %p633_p3 = scmp.lt.s32.totalorder %s155_s9, %s631_s26 }
  0x20   : > { %p628_p1 = pnand %p626_p0, %p614_p13  ;;  %p634_p4 = scmp.lt.s32.totalorder %s632_s30, %s625_s23 }
  0x22   : > { %p629_p2 = pneg %p628_p1  ;;  %p635_p5 = por %p634_p4, %p633_p3 }
  0x24   : > { %p636_p6 = pnand %p635_p5, %p629_p2 }
  0x26   : > { %639 = shalt.err (!%p636_p6)
}
  0x27   : > { %s725_s22 = smov 256   ;;  %s726_s20 = smov 128  }
  0x28   : > { %s727_s28 = smov 8   ;;  %p162_p7 = scmp.lt.s32.totalorder %s722_s18, 9 }
  0x29   : > { %526 = dma.hbm_to_vmem [thread:$0]  (!%p835_p11), %s153_s24, 1024, %s155_s9, %s140_s29, %s725_s22, %s726_s20, %s727_s28  }
  0x2a   : > { %p163_p9 = pnand %p509_p12, %p162_p7 }
  0x2b   : > { %s168_s3 = sand.u32 (!%p163_p9), 1, %s690_s10  }
  0x2c   : > { %166 = sbr.rel (%p163_p9) target bundleno = 243 (0xf3), region = 24  ;;  %s510_s4 = sshll.u32 (!%p163_p9), %s168_s3, 6 }
  0x2d   : > { %s169_s5 = scalar_lea.sflag (!%p163_p9), [#allocation3], %s168_s3  ;;  %s851_s6 = scalar_lea.vmem (!%p163_p9), [#allocation2], %s510_s4 }
  0x31   : > { %681 = dma.done.wait (%p815_p8), %s169_s5, 1024  }
  0x32   : > { %683 = vsyncadd (%p815_p8), %s169_s5, 4294966272  ;;  %s511_s12 = sshll.u32 %s702_s13, 3  ;;  %p208_p10 = scmp.lt.s32.totalorder %s706_s14, 1 }
  0x33   : > { %p210_p11 = scmp.lt.s32.totalorder %s511_s12, 15  ;;  %s1002_s26 = sld [smem:[#allocation5_spill]] }
  0x34   : > { %s1026_s14 = smov (!%p208_p10, %s706_s14), 1 }
  0x35   : > { %s1028_s12 = smov (!%p210_p11, %s511_s12), 15  ;;  %s512_s7 = sshll.u32 %s1026_s14, 4 }
  0x36   : > { %s213_s8 = sadd.s32 %s512_s7, %s1028_s12 }
  0x37   : > { %s513_s9 = sshll.u32 %s213_s8, 3 }
  0x38   : > { %s863_s29 = scalar_lea.vmem %s990_s1, %s513_s9  ;;  %s868_s27 = scalar_lea.vmem %s991_s2, %s513_s9 }
  0x39   : > { %p517_p8 = scmp.ne.s32.totalorder %s1002_s26, 0 }
  0x3b   : > { %230 = sbr.rel (%p517_p8) target bundleno = 73 (0x49), region = 32 }
  0x40   : > { %vm231_vm0 = vcmask 7168   ;;  %v728_v0 = vmov 0.0  }
  0x41   : > { %232 = vst.msk [vmem:[%s863_s29] sm:$0xff] %vm231_vm0, %v728_v0  ;;  %233 = vst.msk [vmem:[%s863_s29 + $0x8] sm:$0xff] %vm231_vm0, %v728_v0 }
  0x42   : > { %234 = vst.msk [vmem:[%s863_s29 + $0x10] sm:$0xff] %vm231_vm0, %v728_v0  ;;  %235 = vst.msk [vmem:[%s863_s29 + $0x18] sm:$0xff] %vm231_vm0, %v728_v0 }
  0x43   : > { %236 = vst.msk [vmem:[%s863_s29 + $0x20] sm:$0xff] %vm231_vm0, %v728_v0  ;;  %237 = vst.msk [vmem:[%s863_s29 + $0x28] sm:$0xff] %vm231_vm0, %v728_v0 }
  0x44   : > { %238 = vst.msk [vmem:[%s863_s29 + $0x30] sm:$0xff] %vm231_vm0, %v728_v0  ;;  %239 = vst.msk [vmem:[%s863_s29 + $0x38] sm:$0xff] %vm231_vm0, %v728_v0 }
  0x45   : > { %240 = vst.msk [vmem:[%s868_s27] sm:$0xff] %vm231_vm0, %v728_v0  ;;  %241 = vst.msk [vmem:[%s868_s27 + $0x8] sm:$0xff] %vm231_vm0, %v728_v0 }
  0x46   : > { %242 = vst.msk [vmem:[%s868_s27 + $0x10] sm:$0xff] %vm231_vm0, %v728_v0  ;;  %243 = vst.msk [vmem:[%s868_s27 + $0x18] sm:$0xff] %vm231_vm0, %v728_v0 }
  0x47   : > { %244 = vst.msk [vmem:[%s868_s27 + $0x20] sm:$0xff] %vm231_vm0, %v728_v0  ;;  %245 = vst.msk [vmem:[%s868_s27 + $0x28] sm:$0xff] %vm231_vm0, %v728_v0 }
  0x48   : > { %246 = vst.msk [vmem:[%s868_s27 + $0x30] sm:$0xff] %vm231_vm0, %v728_v0  ;;  %247 = vst.msk [vmem:[%s868_s27 + $0x38] sm:$0xff] %vm231_vm0, %v728_v0 }
  0x49 PF: > { %v250_v1 = vld [vmem:[%s851_s6 + $0x10] sm:$0xff]  ;;  %v248_v2 = vld [vmem:[%s851_s6] sm:$0xff]  ;;  %v251_v3 = vld [vmem:[%s851_s6 + $0x18] sm:$0xff]  ;;  %vm288_vm1 = vcmask 7168  }
  0x4a   : > { %268 = vadd.xlane.f32.xlu1 %v250_v1  ;;  %264 = vadd.xlane.f32.xlu0 %v248_v2  ;;  %v249_v4 = vld [vmem:[%s851_s6 + $0x8] sm:$0xff]  ;;  %v252_v6 = vld [vmem:[%s851_s6 + $0x20] sm:$0xff]  ;;  %v255_v7 = vld [vmem:[%s851_s6 + $0x38] sm:$0xff]  ;;  %v305_v10 = vmul.f32 %v248_v2, %v248_v2  ;;  %v308_v11 = vmul.f32 %v251_v3, %v251_v3  ;;  %v307_v12 = vmul.f32 %v250_v1, %v250_v1 }
  0x4b   : > { %v253_v5 = vld [vmem:[%s851_s6 + $0x28] sm:$0xff]  ;;  %v254_v8 = vld [vmem:[%s851_s6 + $0x30] sm:$0xff]  ;;  %v306_v9 = vmul.f32 %v249_v4, %v249_v4  ;;  %v309_v14 = vmul.f32 %v252_v6, %v252_v6  ;;  %v312_v15 = vmul.f32 %v255_v7, %v255_v7  ;;  %v256_v18 = vld [vmem:[%s863_s29] sm:$0xff] }
  0x4c   : > { %v310_v13 = vmul.f32 %v253_v5, %v253_v5  ;;  %v311_v16 = vmul.f32 %v254_v8, %v254_v8  ;;  %v258_v17 = vld [vmem:[%s863_s29 + $0x10] sm:$0xff]  ;;  %v259_v23 = vld [vmem:[%s863_s29 + $0x18] sm:$0xff]  ;;  %v257_v24 = vld [vmem:[%s863_s29 + $0x8] sm:$0xff] }
  0x4d   : > { %v261_v29 = vld [vmem:[%s863_s29 + $0x28] sm:$0xff]  ;;  %v260_v30 = vld [vmem:[%s863_s29 + $0x20] sm:$0xff]  ;;  %v263_v35 = vld [vmem:[%s863_s29 + $0x38] sm:$0xff] }
  0x4e   : > { %270 = vadd.xlane.f32.xlu1 %v251_v3  ;;  %266 = vadd.xlane.f32.xlu0 %v249_v4  ;;  %v262_v36 = vld [vmem:[%s863_s29 + $0x30] sm:$0xff]  ;;  %v298_v41 = vld [vmem:[%s868_s27 + $0x8] sm:$0xff]  ;;  %v297_v42 = vld [vmem:[%s868_s27] sm:$0xff] }
  0x4f   : > { %v300_v47 = vld [vmem:[%s868_s27 + $0x18] sm:$0xff]  ;;  %v299_v48 = vld [vmem:[%s868_s27 + $0x10] sm:$0xff]  ;;  %v302_v53 = vld [vmem:[%s868_s27 + $0x28] sm:$0xff] }
  0x50   : > { %v301_v54 = vld [vmem:[%s868_s27 + $0x20] sm:$0xff]  ;;  %v304_v59 = vld [vmem:[%s868_s27 + $0x38] sm:$0xff]  ;;  %v303_v60 = vld [vmem:[%s868_s27 + $0x30] sm:$0xff] }
  0x52   : > { %274 = vadd.xlane.f32.xlu1 %v253_v5  ;;  %272 = vadd.xlane.f32.xlu0 %v252_v6 }
  0x56   : > { %278 = vadd.xlane.f32.xlu1 %v255_v7  ;;  %276 = vadd.xlane.f32.xlu0 %v254_v8 }
  0x5a   : > { %315 = vadd.xlane.f32.xlu1 %v306_v9  ;;  %313 = vadd.xlane.f32.xlu0 %v305_v10 }
  0x5e   : > { %319 = vadd.xlane.f32.xlu1 %v308_v11  ;;  %317 = vadd.xlane.f32.xlu0 %v307_v12 }
  0x62   : > { %323 = vadd.xlane.f32.xlu1 %v310_v13  ;;  %321 = vadd.xlane.f32.xlu0 %v309_v14 }
  0x66   : > { %327 = vadd.xlane.f32.xlu1 %v312_v15  ;;  %325 = vadd.xlane.f32.xlu0 %v311_v16 }
  0xd3   : > { %v269_v19 = vpop.xlane.xlu1 %268  ;;  %v265_v20 = vpop.xlane.xlu0 %264 }
  0xd4   : > { %v282_v21 = vadd.f32 %v269_v19, %v258_v17  ;;  %v280_v22 = vadd.f32 %v265_v20, %v256_v18 }
  0xd6   : > { %291 = vst.msk [vmem:[%s863_s29 + $0x10] sm:$0xff] %vm288_vm1, %v282_v21  ;;  %289 = vst.msk [vmem:[%s863_s29] sm:$0xff] %vm288_vm1, %v280_v22 }
  0xd7   : > { %v271_v25 = vpop.xlane.xlu1 %270  ;;  %v267_v26 = vpop.xlane.xlu0 %266 }
  0xd8   : > { %v283_v27 = vadd.f32 %v271_v25, %v259_v23  ;;  %v281_v28 = vadd.f32 %v267_v26, %v257_v24 }
  0xda   : > { %292 = vst.msk [vmem:[%s863_s29 + $0x18] sm:$0xff] %vm288_vm1, %v283_v27  ;;  %290 = vst.msk [vmem:[%s863_s29 + $0x8] sm:$0xff] %vm288_vm1, %v281_v28 }
  0xdb   : > { %v275_v31 = vpop.xlane.xlu1 %274  ;;  %v273_v32 = vpop.xlane.xlu0 %272 }
  0xdc   : > { %v285_v33 = vadd.f32 %v275_v31, %v261_v29  ;;  %v284_v34 = vadd.f32 %v273_v32, %v260_v30 }
  0xde   : > { %294 = vst.msk [vmem:[%s863_s29 + $0x28] sm:$0xff] %vm288_vm1, %v285_v33  ;;  %293 = vst.msk [vmem:[%s863_s29 + $0x20] sm:$0xff] %vm288_vm1, %v284_v34 }
  0xdf   : > { %v279_v37 = vpop.xlane.xlu1 %278  ;;  %v277_v38 = vpop.xlane.xlu0 %276 }
  0xe0   : > { %v287_v39 = vadd.f32 %v279_v37, %v263_v35  ;;  %v286_v40 = vadd.f32 %v277_v38, %v262_v36 }
  0xe2   : > { %296 = vst.msk [vmem:[%s863_s29 + $0x38] sm:$0xff] %vm288_vm1, %v287_v39  ;;  %295 = vst.msk [vmem:[%s863_s29 + $0x30] sm:$0xff] %vm288_vm1, %v286_v40 }
  0xe3   : > { %v316_v43 = vpop.xlane.xlu1 %315  ;;  %v314_v44 = vpop.xlane.xlu0 %313 }
  0xe4   : > { %v330_v45 = vadd.f32 %v316_v43, %v298_v41  ;;  %v329_v46 = vadd.f32 %v314_v44, %v297_v42 }
  0xe6   : > { %338 = vst.msk [vmem:[%s868_s27 + $0x8] sm:$0xff] %vm288_vm1, %v330_v45  ;;  %337 = vst.msk [vmem:[%s868_s27] sm:$0xff] %vm288_vm1, %v329_v46 }
  0xe7   : > { %v320_v49 = vpop.xlane.xlu1 %319  ;;  %v318_v50 = vpop.xlane.xlu0 %317 }
  0xe8   : > { %v332_v51 = vadd.f32 %v320_v49, %v300_v47  ;;  %v331_v52 = vadd.f32 %v318_v50, %v299_v48 }
  0xea   : > { %340 = vst.msk [vmem:[%s868_s27 + $0x18] sm:$0xff] %vm288_vm1, %v332_v51  ;;  %339 = vst.msk [vmem:[%s868_s27 + $0x10] sm:$0xff] %vm288_vm1, %v331_v52 }
  0xeb   : > { %v324_v55 = vpop.xlane.xlu1 %323  ;;  %v322_v56 = vpop.xlane.xlu0 %321 }
  0xec   : > { %v334_v57 = vadd.f32 %v324_v55, %v302_v53  ;;  %v333_v58 = vadd.f32 %v322_v56, %v301_v54 }
  0xee   : > { %342 = vst.msk [vmem:[%s868_s27 + $0x28] sm:$0xff] %vm288_vm1, %v334_v57  ;;  %341 = vst.msk [vmem:[%s868_s27 + $0x20] sm:$0xff] %vm288_vm1, %v333_v58 }
  0xef   : > { %v328_v61 = vpop.xlane.xlu1 %327  ;;  %v326_v62 = vpop.xlane.xlu0 %325 }
  0xf0   : > { %v336_v63 = vadd.f32 %v328_v61, %v304_v59  ;;  %v335_v0 = vadd.f32 %v326_v62, %v303_v60 }
  0xf2   : > { %344 = vst.msk [vmem:[%s868_s27 + $0x38] sm:$0xff] %vm288_vm1, %v336_v63  ;;  %343 = vst.msk [vmem:[%s868_s27 + $0x30] sm:$0xff] %vm288_vm1, %v335_v0 }
  0xf3 PF: > { %s16_s18 = sadd.s32 1, %s722_s18   ;;  %s1003_s30 = sld [smem:[#allocation6_spill]] }
  0xf4   : > { %p13_p12 = scmp.ge.s32.totalorder %s16_s18, 10   ;;  %s1004_s22 = sld [smem:[#allocation7_spill]] }
  0xf5   : > { %s1005_s20 = sld [smem:[#allocation8_spill]]  ;;  %s1006_s9 = smov %s690_s10 }
  0xf6   : > { %s1007_s10 = smov %s694_s11  ;;  %s1008_s11 = smov %s829_s19 }
  0xf7   : > { %s1009_s12 = smov %s710_s15  ;;  %s1010_s13 = smov %s714_s16 }
  0xf8   : > { %s1011_s14 = smov %s718_s17  ;;  %15 = sbr.rel (!%p13_p12) target bundleno = 6 (0x6), region = 80 }
  0xf9   : > { %s1012_s15 = smov %s1003_s30 }
  0xfa   : > { %s1013_s16 = smov %s1004_s22 }
  0xfb   : > { %s1014_s17 = smov %s1005_s20 }
  0xfd   :  { %400 = vsyncpa [#allocation3], 1 }
  0xfe   :  { %402 = vsyncpa [#allocation3 + $0x1], 1 }

</bundles_post_ra>
